<compile_context>
chip_gen: v7x
topology: tpu7x:2x2x1
jax: 0.10.0
libtpu: 0.0.40
codegen_flags: <defaults>
</compile_context>

<pallas_src>
import numpy as np
import jax
import jax.numpy as jnp
from jax.experimental import pallas as pl
from jax.experimental.pallas import tpu as pltpu

EPS_COS = 1e-8          # nn.CosineSimilarity default eps
MAX_LANE_TILE = 8192    # max lane-dense tile width for kernel 1


def _round_up(x, m):
    return ((x + m - 1) // m) * m


# ---------------------------------------------------------------------------
# Kernel 1: fused PredLoss + ReconstLoss masked row-norm reduction.
#   inputs : pred0, gt0, pred1, gt1  -- each (2, l_pad), row 0 = x, row 1 = y
#   output : (4, 1) = [reg_sum, reconst_sum, reg_cnt, reconst_cnt]
# ---------------------------------------------------------------------------
def _masked_norm_kernel(p0_ref, g0_ref, p1_ref, g1_ref, out_ref,
                        n0_acc, m0_acc, n1_acc, m1_acc):
    @pl.when(pl.program_id(0) == 0)
    def _init():
        n0_acc[...] = jnp.zeros_like(n0_acc)
        m0_acc[...] = jnp.zeros_like(m0_acc)
        n1_acc[...] = jnp.zeros_like(n1_acc)
        m1_acc[...] = jnp.zeros_like(m1_acc)

    def masked_norm(p_ref, g_ref):
        g = g_ref[...]                                # (2, T)
        e = g - p_ref[...]                            # whole-vreg VPU subtract
        e2 = e * e
        norm = jnp.sqrt(e2[0:1, :] + e2[1:2, :])      # (1, T)
        # torch.nonzero(gt.view(-1,2)[:,0]) semantics: valid iff gt_x != 0
        mask = (g[0:1, :] != 0.0).astype(jnp.float32)
        return norm * mask, mask

    n0, m0 = masked_norm(p0_ref, g0_ref)
    n1, m1 = masked_norm(p1_ref, g1_ref)
    n0_acc[...] += n0
    m0_acc[...] += m0
    n1_acc[...] += n1
    m1_acc[...] += m1

    @pl.when(pl.program_id(0) == pl.num_programs(0) - 1)
    def _finalize():
        s0 = jnp.sum(n0_acc[...], axis=-1, keepdims=True)   # (1, 1)
        s1 = jnp.sum(n1_acc[...], axis=-1, keepdims=True)
        c0 = jnp.sum(m0_acc[...], axis=-1, keepdims=True)
        c1 = jnp.sum(m1_acc[...], axis=-1, keepdims=True)
        out_ref[...] = jnp.concatenate([s0, s1, c0, c1], axis=0)   # (4, 1)


def fused_masked_norm_loss(pred_out, pred_gt, reconst_out, reconst_gt,
                           max_tile=MAX_LANE_TILE):
    """Both masked L2-norm reductions in one lane-dense, tiled pallas_call."""
    def xy(t):
        # (..., 2) -> (2, L) lane-dense rows [x; y]
        return jnp.transpose(t.reshape(-1, 2).astype(jnp.float32))

    p0, g0 = xy(pred_out), xy(pred_gt)
    p1, g1 = xy(reconst_out), xy(reconst_gt)

    L = max(p0.shape[1], p1.shape[1], 1)
    l_aligned = max(128, _round_up(L, 128))
    tile = l_aligned if l_aligned <= max_tile else max_tile
    l_pad = max(tile, _round_up(L, tile))

    def pad(a):
        return jnp.pad(a, ((0, 0), (0, l_pad - a.shape[1])))

    p0, g0, p1, g1 = pad(p0), pad(g0), pad(p1), pad(g1)

    spec = pl.BlockSpec((2, tile), lambda l: (0, l))
    out = pl.pallas_call(
        _masked_norm_kernel,
        out_shape=jax.ShapeDtypeStruct((4, 1), jnp.float32),
        grid_spec=pltpu.PrefetchScalarGridSpec(
            num_scalar_prefetch=0,
            grid=(l_pad // tile,),
            in_specs=[spec, spec, spec, spec],
            out_specs=pl.BlockSpec((4, 1), lambda l: (0, 0)),
            scratch_shapes=[pltpu.VMEM((1, tile), jnp.float32),
                            pltpu.VMEM((1, tile), jnp.float32),
                            pltpu.VMEM((1, tile), jnp.float32),
                            pltpu.VMEM((1, tile), jnp.float32)]),
        compiler_params=pltpu.CompilerParams(
            dimension_semantics=("arbitrary",)),
    )(p0, g0, p1, g1)
    # reg_sum, reg_cnt, reconst_sum, reconst_cnt
    return out[0, 0], out[2, 0], out[1, 0], out[3, 0]


# ---------------------------------------------------------------------------
# Kernel 2: contrastive ID loss, MXU cosine sims, tiled over the pair axis.
#   hist (Nh, Dp), fut (Nf, Dp)   : VMEM-resident embedding tables
#   asel (TP, Nh)                 : per-pair one-hot anchor selector
#   pmask / nmask (TP, Nf)        : per-pair pos/neg membership counts
#   out (1, 1)                    : total -log(sum_pos / (sum_pos + sum_neg))
# ---------------------------------------------------------------------------
def _id_loss_kernel(hist_ref, fut_ref, asel_ref, pmask_ref, nmask_ref, out_ref):
    @pl.when(pl.program_id(0) == 0)
    def _init():
        out_ref[...] = jnp.zeros_like(out_ref)

    hist = hist_ref[...]                                        # (Nh, Dp)
    fut = fut_ref[...]                                          # (Nf, Dp)

    # torch nn.CosineSimilarity clamps each norm separately to eps.
    h_norm = jnp.sqrt(jnp.sum(hist * hist, axis=-1, keepdims=True))
    f_norm = jnp.sqrt(jnp.sum(fut * fut, axis=-1, keepdims=True))
    hist_n = hist / jnp.maximum(h_norm, EPS_COS)
    fut_n = fut / jnp.maximum(f_norm, EPS_COS)

    # All-pairs cosine sims on the MXU, then one-hot anchor selection.
    sims = jnp.dot(hist_n, fut_n.T, preferred_element_type=jnp.float32)   # (Nh, Nf)
    asims = jnp.dot(asel_ref[...], sims, preferred_element_type=jnp.float32)  # (TP, Nf)

    pm = pmask_ref[...]                                         # (TP, Nf)
    nm = nmask_ref[...]
    val = asims + 1.0                                           # cos_sim + 1
    sp = jnp.sum(pm * val, axis=-1, keepdims=True)              # (TP, 1)
    sn = jnp.sum(nm * val, axis=-1, keepdims=True)

    # Padded pair rows have an all-zero pmask: force their term to -log(1) = 0.
    has_pos = jnp.sum(pm, axis=-1, keepdims=True)
    pad_row = (has_pos == 0.0).astype(jnp.float32)
    per_pair = -jnp.log((sp + pad_row) / (sp + sn + pad_row))   # (TP, 1)

    out_ref[...] += jnp.sum(per_pair, axis=0, keepdims=True)    # (1, 1)


def id_loss(ids_fut, ids_hist, ego_fut_aug_idcs, actor_idcs_mod, tile_p=128):
    """IDloss.forward: ragged index walking on host, one tiled kernel call."""
    # TODO(synk): the ragged per-batch index walking is inherently host-side
    # Python/numpy bookkeeping (data-dependent list shapes), as in PyTorch.
    anchor_idx, pos_lists, neg_lists = [], [], []
    for i in range(len(ego_fut_aug_idcs)):
        e = np.asarray(ego_fut_aug_idcs[i])
        e0 = int(e[0])
        actor0 = np.asarray(actor_idcs_mod[e0])
        vehicle_num = len(actor0) - 1
        aug_num = len(e)
        if aug_num > 1:
            for j in range(vehicle_num):
                a_idx = int(actor0[j + 1] - (e0 + 1))
                pos = [int(np.asarray(actor_idcs_mod[int(e[k])])[j + 1]
                           - (int(e[k]) + 1))
                       for k in range(aug_num) if k > 0]
                neg = np.concatenate((actor0[1:j + 1] - (e0 + 1),
                                      actor0[j + 2:] - (e0 + 1))
                                     ).astype(np.int64).tolist()
                anchor_idx.append(a_idx)
                pos_lists.append(pos)
                neg_lists.append(neg)

    P = len(anchor_idx)
    if P == 0:
        return jnp.float32(0.0), 0

    Nh, D = ids_hist.shape
    Nf = ids_fut.shape[0]
    Dp = _round_up(D, 128)
    Nh_pad = _round_up(Nh, 128)     # lane/MXU-friendly padding of the tables
    Nf_pad = _round_up(Nf, 128)

    TP = min(tile_p, _round_up(P, 8))
    P_pad = _round_up(P, TP)

    asel = np.zeros((P_pad, Nh_pad), np.float32)
    pmask = np.zeros((P_pad, Nf_pad), np.float32)
    nmask = np.zeros((P_pad, Nf_pad), np.float32)
    for p, (a, pos, neg) in enumerate(zip(anchor_idx, pos_lists, neg_lists)):
        asel[p, a] = 1.0
        for q in pos:
            pmask[p, q] += 1.0
        for q in neg:
            nmask[p, q] += 1.0

    hist = jnp.pad(jnp.asarray(ids_hist, jnp.float32),
                   ((0, Nh_pad - Nh), (0, Dp - D)))
    fut = jnp.pad(jnp.asarray(ids_fut, jnp.float32),
                  ((0, Nf_pad - Nf), (0, Dp - D)))

    total = pl.pallas_call(
        _id_loss_kernel,
        out_shape=jax.ShapeDtypeStruct((1, 1), jnp.float32),
        grid_spec=pltpu.PrefetchScalarGridSpec(
            num_scalar_prefetch=0,
            grid=(P_pad // TP,),
            in_specs=[
                pl.BlockSpec((Nh_pad, Dp), lambda p: (0, 0)),   # hist (resident)
                pl.BlockSpec((Nf_pad, Dp), lambda p: (0, 0)),   # fut  (resident)
                pl.BlockSpec((TP, Nh_pad), lambda p: (p, 0)),   # anchor one-hot
                pl.BlockSpec((TP, Nf_pad), lambda p: (p, 0)),   # pos mask
                pl.BlockSpec((TP, Nf_pad), lambda p: (p, 0)),   # neg mask
            ],
            out_specs=pl.BlockSpec((1, 1), lambda p: (0, 0))),
        compiler_params=pltpu.CompilerParams(
            dimension_semantics=("arbitrary",)),
    )(hist, fut, jnp.asarray(asel), jnp.asarray(pmask), jnp.asarray(nmask))
    return total[0, 0], P


# ---------------------------------------------------------------------------
# Loss.forward equivalent
# ---------------------------------------------------------------------------
def loss_forward(config, pred_out, pred_gt, reconstruction_out, reconstruction_gt,
                 ids_hist, ids_fut, ego_fut_aug_idcs, actor_idcs_mod):
    reg_loss, reg_cnt, reconst_loss, reconst_cnt = fused_masked_norm_loss(
        pred_out, pred_gt, reconstruction_out, reconstruction_gt)
    repres_loss, repres_cnt = id_loss(ids_fut, ids_hist,
                                      ego_fut_aug_idcs, actor_idcs_mod)
    loss = {
        'reg_loss': reg_loss, 'reg_loss_cnt': reg_cnt,
        'reconst_loss': reconst_loss, 'reconst_loss_cnt': reconst_cnt,
        'repres_loss': repres_loss, 'repres_loss_cnt': repres_cnt,
    }
    loss_out = (config['reg_coef'] * (loss['reg_loss'] / (loss['reg_loss_cnt'] + 1e-10))
                + config['repres_coef'] * (loss['repres_loss'] / (loss['repres_loss_cnt'] + 1e-10))
                + config['reconst_coef'] * (loss['reconst_loss'] / (loss['reconst_loss_cnt'] + 1e-10)))
    return loss_out, loss


# ---------------------------------------------------------------------------
# Pure-numpy reference (mirrors the PyTorch code) for verification
# ---------------------------------------------------------------------------
def _np_masked_norm(pred, gt):
    gt2 = np.asarray(gt, np.float32).reshape(-1, 2)
    p2 = np.asarray(pred, np.float32).reshape(-1, 2)
    nz = np.nonzero(gt2[:, 0])[0]
    err = (gt2 - p2)[nz]
    return float(np.sum(np.linalg.norm(err, axis=1))), len(nz)


def _np_cos(a, b, eps=1e-8):
    an = max(float(np.linalg.norm(a[0])), eps)
    bn = np.maximum(np.linalg.norm(b, axis=1), eps)
    return (b @ a[0]) / (an * bn)


def _np_id_loss(ids_fut, ids_hist, ego_fut_aug_idcs, actor_idcs_mod):
    ids_fut = np.asarray(ids_fut, np.float32)
    ids_hist = np.asarray(ids_hist, np.float32)
    tot, cnt = 0.0, 0
    for i in range(len(ego_fut_aug_idcs)):
        e = np.asarray(ego_fut_aug_idcs[i])
        e0 = int(e[0])
        vehicle_num = len(actor_idcs_mod[e0]) - 1
        if len(e) > 1:
            for j in range(vehicle_num):
                anchor_idx = int(actor_idcs_mod[e0][j + 1] - (e0 + 1))
                pos_idx = [int(actor_idcs_mod[int(e[k])][j + 1] - (int(e[k]) + 1))
                           for k in range(len(e)) if k > 0]
                neg_idx = np.concatenate((actor_idcs_mod[e0][1:j + 1] - (e0 + 1),
                                          actor_idcs_mod[e0][j + 2:] - (e0 + 1)))
                anchor = ids_hist[anchor_idx:anchor_idx + 1]
                sp = float(np.sum(_np_cos(anchor, ids_fut[np.asarray(pos_idx)]) + 1.0))
                sn = float(np.sum(_np_cos(anchor, ids_fut[neg_idx.astype(int)]) + 1.0)) \
                    if len(neg_idx) > 0 else 0.0
                tot += -np.log(sp / (sp + sn))
                cnt += 1
    return tot, cnt


if __name__ == "__main__":
    config = {'reg_coef': 1.0, 'repres_coef': 0.5, 'reconst_coef': 1.0}

    key = jax.random.PRNGKey(0)
    k1, k2, k3, k4, k5, k6 = jax.random.split(key, 6)

    # trajectory tensors: (num_actors=6, T=8, 2)
    pred_out = jax.random.normal(k1, (6, 8, 2), jnp.float32)
    pred_gt = jax.random.normal(k2, (6, 8, 2), jnp.float32)
    pred_gt = pred_gt.at[:, -2:, :].set(0.0)          # padded/invalid timesteps
    reconstruction_out = jax.random.normal(k3, (6, 8, 2), jnp.float32)
    reconstruction_gt = jax.random.normal(k4, (6, 8, 2), jnp.float32)
    reconstruction_gt = reconstruction_gt.at[:, -3:, :].set(0.0)

    # id embeddings: A=3 augmentations, V=3 vehicles, hidden D=32
    A, V, D = 3, 3, 32
    ids_hist = jax.random.normal(k5, (A * V, D), jnp.float32)
    ids_fut = jax.random.normal(k6, (A * V, D), jnp.float32)

    # index bookkeeping (host side, as in the PyTorch dataloader):
    # aug m's actor indices are a contiguous range [m*(V+1), (m+1)*(V+1)),
    # whose first entry is the ego; subtracting (m+1) maps vehicle j of aug m
    # to row m*V + j of ids_hist / ids_fut.
    ego_fut_aug_idcs = [np.arange(A, dtype=np.int64)]
    actor_idcs_mod = [np.arange(m * (V + 1), (m + 1) * (V + 1), dtype=np.int64)
                      for m in range(A)]

    loss_out, loss = loss_forward(config, pred_out, pred_gt,
                                  reconstruction_out, reconstruction_gt,
                                  ids_hist, ids_fut,
                                  ego_fut_aug_idcs, actor_idcs_mod)
    loss_out = jax.block_until_ready(loss_out)

    # ---- verify against numpy reference of the PyTorch semantics ----
    reg_s, reg_c = _np_masked_norm(pred_out, pred_gt)
    rec_s, rec_c = _np_masked_norm(reconstruction_out, reconstruction_gt)
    rep_s, rep_c = _np_id_loss(ids_fut, ids_hist, ego_fut_aug_idcs, actor_idcs_mod)
    ref_total = (config['reg_coef'] * reg_s / (reg_c + 1e-10)
                 + config['repres_coef'] * rep_s / (rep_c + 1e-10)
                 + config['reconst_coef'] * rec_s / (rec_c + 1e-10))

    np.testing.assert_allclose(float(loss['reg_loss']), reg_s, rtol=1e-4, atol=1e-4)
    np.testing.assert_allclose(float(loss['reg_loss_cnt']), reg_c, rtol=0, atol=0)
    np.testing.assert_allclose(float(loss['reconst_loss']), rec_s, rtol=1e-4, atol=1e-4)
    np.testing.assert_allclose(float(loss['reconst_loss_cnt']), rec_c, rtol=0, atol=0)
    # MXU f32 matmuls may run at reduced internal precision -> looser tolerance.
    np.testing.assert_allclose(float(loss['repres_loss']), rep_s, rtol=2e-2, atol=2e-2)
    assert loss['repres_loss_cnt'] == rep_c
    np.testing.assert_allclose(float(loss_out), ref_total, rtol=1e-2, atol=1e-2)

    print("KERNEL_OK")
</pallas_src>

<mosaic_0001>
module attributes {stable_mosaic.version = 11 : i64} {
  func.func @_masked_norm_kernel(%arg0: i32, %arg1: memref<2x128xf32, #tpu.memory_space<vmem>>, %arg2: memref<2x128xf32, #tpu.memory_space<vmem>>, %arg3: memref<2x128xf32, #tpu.memory_space<vmem>>, %arg4: memref<2x128xf32, #tpu.memory_space<vmem>>, %arg5: memref<4x1xf32, #tpu.memory_space<vmem>>, %arg6: memref<1x128xf32, #tpu.memory_space<vmem>>, %arg7: memref<1x128xf32, #tpu.memory_space<vmem>>, %arg8: memref<1x128xf32, #tpu.memory_space<vmem>>, %arg9: memref<1x128xf32, #tpu.memory_space<vmem>>) attributes {dimension_semantics = [#tpu.dimension_semantics<arbitrary>], iteration_bounds = array<i64: 1>, scalar_prefetch = 0 : i64, scratch_operands = 4 : i64, tpu.core_type = #tpu.core_type<tc>, window_params = [{transform_indices = @transform_0, window_bounds = array<i64: 2, 128>}, {transform_indices = @transform_1, window_bounds = array<i64: 2, 128>}, {transform_indices = @transform_2, window_bounds = array<i64: 2, 128>}, {transform_indices = @transform_3, window_bounds = array<i64: 2, 128>}, {pipeline_mode = #tpu.pipeline_mode<synchronous>, transform_indices = @transform_4, window_bounds = array<i64: 4, 1>}]} {
    %c0_i32 = arith.constant 0 : i32
    %0 = arith.cmpi eq, %arg0, %c0_i32 : i32
    %1 = arith.extui %0 : i1 to i32
    %c0_i32_0 = arith.constant 0 : i32
    %2 = arith.cmpi ne, %1, %c0_i32_0 : i32
    scf.if %2 {
      %cst_27 = arith.constant 0.000000e+00 : f32
      %46 = vector.broadcast %cst_27 : f32 to vector<1x128xf32>
      %c0_28 = arith.constant 0 : index
      %c0_29 = arith.constant 0 : index
      %47 = vector.load %arg6[%c0_28, %c0_29] : memref<1x128xf32, #tpu.memory_space<vmem>>, vector<1x128xf32>
      tpu.vector_store %arg6[%c0_28, %c0_29], %46 {strides = array<i32>} : memref<1x128xf32, #tpu.memory_space<vmem>>, vector<1x128xf32>,
      %cst_30 = arith.constant 0.000000e+00 : f32
      %48 = vector.broadcast %cst_30 : f32 to vector<1x128xf32>
      %c0_31 = arith.constant 0 : index
      %c0_32 = arith.constant 0 : index
      %49 = vector.load %arg7[%c0_31, %c0_32] : memref<1x128xf32, #tpu.memory_space<vmem>>, vector<1x128xf32>
      tpu.vector_store %arg7[%c0_31, %c0_32], %48 {strides = array<i32>} : memref<1x128xf32, #tpu.memory_space<vmem>>, vector<1x128xf32>,
      %cst_33 = arith.constant 0.000000e+00 : f32
      %50 = vector.broadcast %cst_33 : f32 to vector<1x128xf32>
      %c0_34 = arith.constant 0 : index
      %c0_35 = arith.constant 0 : index
      %51 = vector.load %arg8[%c0_34, %c0_35] : memref<1x128xf32, #tpu.memory_space<vmem>>, vector<1x128xf32>
      tpu.vector_store %arg8[%c0_34, %c0_35], %50 {strides = array<i32>} : memref<1x128xf32, #tpu.memory_space<vmem>>, vector<1x128xf32>,
      %cst_36 = arith.constant 0.000000e+00 : f32
      %52 = vector.broadcast %cst_36 : f32 to vector<1x128xf32>
      %c0_37 = arith.constant 0 : index
      %c0_38 = arith.constant 0 : index
      %53 = vector.load %arg9[%c0_37, %c0_38] : memref<1x128xf32, #tpu.memory_space<vmem>>, vector<1x128xf32>
      tpu.vector_store %arg9[%c0_37, %c0_38], %52 {strides = array<i32>} : memref<1x128xf32, #tpu.memory_space<vmem>>, vector<1x128xf32>,
    } else {
    }
    %c0 = arith.constant 0 : index
    %c0_1 = arith.constant 0 : index
    %3 = vector.load %arg2[%c0, %c0_1] : memref<2x128xf32, #tpu.memory_space<vmem>>, vector<2x128xf32>
    %c0_2 = arith.constant 0 : index
    %c0_3 = arith.constant 0 : index
    %4 = vector.load %arg1[%c0_2, %c0_3] : memref<2x128xf32, #tpu.memory_space<vmem>>, vector<2x128xf32>
    %5 = arith.subf %3, %4 : vector<2x128xf32>
    %6 = arith.mulf %5, %5 : vector<2x128xf32>
    %7 = vector.extract_strided_slice %6 {offsets = [0, 0], sizes = [1, 128], strides = [1, 1]} : vector<2x128xf32> to vector<1x128xf32>
    %8 = vector.extract_strided_slice %6 {offsets = [1, 0], sizes = [1, 128], strides = [1, 1]} : vector<2x128xf32> to vector<1x128xf32>
    %9 = arith.addf %7, %8 : vector<1x128xf32>
    %10 = math.sqrt %9 : vector<1x128xf32>
    %11 = vector.extract_strided_slice %3 {offsets = [0, 0], sizes = [1, 128], strides = [1, 1]} : vector<2x128xf32> to vector<1x128xf32>
    %cst = arith.constant 0.000000e+00 : f32
    %12 = vector.broadcast %cst : f32 to vector<1x128xf32>
    %13 = arith.cmpf one, %11, %12 : vector<1x128xf32>
    %14 = arith.extui %13 : vector<1x128xi1> to vector<1x128xi32>
    %15 = arith.sitofp %14 : vector<1x128xi32> to vector<1x128xf32>
    %16 = arith.mulf %10, %15 : vector<1x128xf32>
    %c0_4 = arith.constant 0 : index
    %c0_5 = arith.constant 0 : index
    %17 = vector.load %arg4[%c0_4, %c0_5] : memref<2x128xf32, #tpu.memory_space<vmem>>, vector<2x128xf32>
    %c0_6 = arith.constant 0 : index
    %c0_7 = arith.constant 0 : index
    %18 = vector.load %arg3[%c0_6, %c0_7] : memref<2x128xf32, #tpu.memory_space<vmem>>, vector<2x128xf32>
    %19 = arith.subf %17, %18 : vector<2x128xf32>
    %20 = arith.mulf %19, %19 : vector<2x128xf32>
    %21 = vector.extract_strided_slice %20 {offsets = [0, 0], sizes = [1, 128], strides = [1, 1]} : vector<2x128xf32> to vector<1x128xf32>
    %22 = vector.extract_strided_slice %20 {offsets = [1, 0], sizes = [1, 128], strides = [1, 1]} : vector<2x128xf32> to vector<1x128xf32>
    %23 = arith.addf %21, %22 : vector<1x128xf32>
    %24 = math.sqrt %23 : vector<1x128xf32>
    %25 = vector.extract_strided_slice %17 {offsets = [0, 0], sizes = [1, 128], strides = [1, 1]} : vector<2x128xf32> to vector<1x128xf32>
    %cst_8 = arith.constant 0.000000e+00 : f32
    %26 = vector.broadcast %cst_8 : f32 to vector<1x128xf32>
    %27 = arith.cmpf one, %25, %26 : vector<1x128xf32>
    %28 = arith.extui %27 : vector<1x128xi1> to vector<1x128xi32>
    %29 = arith.sitofp %28 : vector<1x128xi32> to vector<1x128xf32>
    %30 = arith.mulf %24, %29 : vector<1x128xf32>
    %c0_9 = arith.constant 0 : index
    %c0_10 = arith.constant 0 : index
    %31 = vector.load %arg6[%c0_9, %c0_10] : memref<1x128xf32, #tpu.memory_space<vmem>>, vector<1x128xf32>
    %32 = arith.addf %31, %16 : vector<1x128xf32>
    %c0_11 = arith.constant 0 : index
    %c0_12 = arith.constant 0 : index
    %33 = vector.load %arg6[%c0_11, %c0_12] : memref<1x128xf32, #tpu.memory_space<vmem>>, vector<1x128xf32>
    tpu.vector_store %arg6[%c0_11, %c0_12], %32 {strides = array<i32>} : memref<1x128xf32, #tpu.memory_space<vmem>>, vector<1x128xf32>,
    %c0_13 = arith.constant 0 : index
    %c0_14 = arith.constant 0 : index
    %34 = vector.load %arg7[%c0_13, %c0_14] : memref<1x128xf32, #tpu.memory_space<vmem>>, vector<1x128xf32>
    %35 = arith.addf %34, %15 : vector<1x128xf32>
    %c0_15 = arith.constant 0 : index
    %c0_16 = arith.constant 0 : index
    %36 = vector.load %arg7[%c0_15, %c0_16] : memref<1x128xf32, #tpu.memory_space<vmem>>, vector<1x128xf32>
    tpu.vector_store %arg7[%c0_15, %c0_16], %35 {strides = array<i32>} : memref<1x128xf32, #tpu.memory_space<vmem>>, vector<1x128xf32>,
    %c0_17 = arith.constant 0 : index
    %c0_18 = arith.constant 0 : index
    %37 = vector.load %arg8[%c0_17, %c0_18] : memref<1x128xf32, #tpu.memory_space<vmem>>, vector<1x128xf32>
    %38 = arith.addf %37, %30 : vector<1x128xf32>
    %c0_19 = arith.constant 0 : index
    %c0_20 = arith.constant 0 : index
    %39 = vector.load %arg8[%c0_19, %c0_20] : memref<1x128xf32, #tpu.memory_space<vmem>>, vector<1x128xf32>
    tpu.vector_store %arg8[%c0_19, %c0_20], %38 {strides = array<i32>} : memref<1x128xf32, #tpu.memory_space<vmem>>, vector<1x128xf32>,
    %c0_21 = arith.constant 0 : index
    %c0_22 = arith.constant 0 : index
    %40 = vector.load %arg9[%c0_21, %c0_22] : memref<1x128xf32, #tpu.memory_space<vmem>>, vector<1x128xf32>
    %41 = arith.addf %40, %29 : vector<1x128xf32>
    %c0_23 = arith.constant 0 : index
    %c0_24 = arith.constant 0 : index
    %42 = vector.load %arg9[%c0_23, %c0_24] : memref<1x128xf32, #tpu.memory_space<vmem>>, vector<1x128xf32>
    tpu.vector_store %arg9[%c0_23, %c0_24], %41 {strides = array<i32>} : memref<1x128xf32, #tpu.memory_space<vmem>>, vector<1x128xf32>,
    %c0_i32_25 = arith.constant 0 : i32
    %43 = arith.cmpi eq, %arg0, %c0_i32_25 : i32
    %44 = arith.extui %43 : i1 to i32
    %c0_i32_26 = arith.constant 0 : i32
    %45 = arith.cmpi ne, %44, %c0_i32_26 : i32
    scf.if %45 {
      %c0_27 = arith.constant 0 : index
      %c0_28 = arith.constant 0 : index
      %46 = vector.load %arg6[%c0_27, %c0_28] : memref<1x128xf32, #tpu.memory_space<vmem>>, vector<1x128xf32>
      %cst_29 = arith.constant dense<0.000000e+00> : vector<1xf32>
      %47 = vector.multi_reduction <add>, %46, %cst_29 [1] : vector<1x128xf32> to vector<1xf32>
      %48 = vector.shape_cast %47 : vector<1xf32> to vector<1x1xf32>
      %c0_30 = arith.constant 0 : index
      %c0_31 = arith.constant 0 : index
      %49 = vector.load %arg8[%c0_30, %c0_31] : memref<1x128xf32, #tpu.memory_space<vmem>>, vector<1x128xf32>
      %cst_32 = arith.constant dense<0.000000e+00> : vector<1xf32>
      %50 = vector.multi_reduction <add>, %49, %cst_32 [1] : vector<1x128xf32> to vector<1xf32>
      %51 = vector.shape_cast %50 : vector<1xf32> to vector<1x1xf32>
      %c0_33 = arith.constant 0 : index
      %c0_34 = arith.constant 0 : index
      %52 = vector.load %arg7[%c0_33, %c0_34] : memref<1x128xf32, #tpu.memory_space<vmem>>, vector<1x128xf32>
      %cst_35 = arith.constant dense<0.000000e+00> : vector<1xf32>
      %53 = vector.multi_reduction <add>, %52, %cst_35 [1] : vector<1x128xf32> to vector<1xf32>
      %54 = vector.shape_cast %53 : vector<1xf32> to vector<1x1xf32>
      %c0_36 = arith.constant 0 : index
      %c0_37 = arith.constant 0 : index
      %55 = vector.load %arg9[%c0_36, %c0_37] : memref<1x128xf32, #tpu.memory_space<vmem>>, vector<1x128xf32>
      %cst_38 = arith.constant dense<0.000000e+00> : vector<1xf32>
      %56 = vector.multi_reduction <add>, %55, %cst_38 [1] : vector<1x128xf32> to vector<1xf32>
      %57 = vector.shape_cast %56 : vector<1xf32> to vector<1x1xf32>
      %58 = tpu.concatenate %48, %51, %54, %57 in 0 : vector<1x1xf32>, vector<1x1xf32>, vector<1x1xf32>, vector<1x1xf32> -> vector<4x1xf32>
      %c0_39 = arith.constant 0 : index
      %c0_40 = arith.constant 0 : index
      %59 = vector.load %arg5[%c0_39, %c0_40] : memref<4x1xf32, #tpu.memory_space<vmem>>, vector<4x1xf32>
      tpu.vector_store %arg5[%c0_39, %c0_40], %58 {strides = array<i32>} : memref<4x1xf32, #tpu.memory_space<vmem>>, vector<4x1xf32>,
    } else {
    }
    return
  }
  func.func @transform_0(%arg0: i32) -> (i32, i32) {
    %c0_i32 = arith.constant 0 : i32
    %c0_i32_0 = arith.constant 0 : i32
    return %c0_i32, %arg0 : i32, i32
  }
  func.func @transform_1(%arg0: i32) -> (i32, i32) {
    %c0_i32 = arith.constant 0 : i32
    %c0_i32_0 = arith.constant 0 : i32
    return %c0_i32, %arg0 : i32, i32
  }
  func.func @transform_2(%arg0: i32) -> (i32, i32) {
    %c0_i32 = arith.constant 0 : i32
    %c0_i32_0 = arith.constant 0 : i32
    return %c0_i32, %arg0 : i32, i32
  }
  func.func @transform_3(%arg0: i32) -> (i32, i32) {
    %c0_i32 = arith.constant 0 : i32
    %c0_i32_0 = arith.constant 0 : i32
    return %c0_i32, %arg0 : i32, i32
  }
  func.func @transform_4(%arg0: i32) -> (i32, i32) {
    %c0_i32 = arith.constant 0 : i32
    %c0_i32_0 = arith.constant 0 : i32
    %c0_i32_1 = arith.constant 0 : i32
    return %c0_i32, %c0_i32_0 : i32, i32
  }
}

</mosaic_0001>

<bundles_post_ra>
// kernel: tpu_custom_call.1
= control target key start
LH: loop header
LB: loop body
LE: loop exit
PB: predicated region body
PF: predicated region fallthrough
CT: control target
= control target key end

     0   :  { %9 = vsyncpa [#allocation7], 0  ;;  %s160_s15 = smov [#allocation6]   ;;  %s216_s0 = inlined_call_operand.hbm [shape: f32[2,128], index: 0, kind: input, shape index: {}]   ;;  %s217_s1 = inlined_call_operand.vmem [shape: f32[2,128], index: 1, kind: input, shape index: {}]   ;;  %s218_s2 = inlined_call_operand.vmem [shape: f32[2,128], index: 2, kind: input, shape index: {}]   ;;  %s219_s3 = inlined_call_operand.vmem [shape: f32[2,128], index: 3, kind: input, shape index: {}]   ;;  %s220_s4 = inlined_call_operand.vmem [shape: f32[4,1], index: 4, kind: output, shape index: {}]  }
   0x1   :  { %s16_s16 = sshll.u32 %s160_s15, 4  ;;  %s136_s19 = scalar_lea.hbm %s216_s0, 32  ;;  %s17_s16 = int_to_ptr.vmem [resolvable:$true] %s16_s16 }
   0x2   :  { %p137_p0 = scmp.ne.s32.totalorder %s216_s0, %s136_s19  ;;  %p140_p1 = scmp.lt.u32.totalorder %s136_s19, %s216_s0 }
   0x4   :  { %p142_p2 = pnand %p140_p1, %p137_p0 }
   0x6   :  { %145 = shalt.err (!%p142_p2)
}
   0x7   :  { %s146_s24 = scalar_lea.vmem %s17_s16, 32  ;;  %p151_p4 = scmp.lt.s32.totalorder %s17_s16, %s17_s16 }
   0x8   :  { %p147_p3 = scmp.ne.s32.totalorder %s17_s16, %s146_s24  ;;  %p152_p5 = scmp.lt.s32.totalorder %s146_s24, %s146_s24 }
   0xa   :  { %p153_p6 = por %p152_p5, %p151_p4 }
   0xc   :  { %p154_p7 = pnand %p153_p6, %p147_p3 }
   0xe   :  { %157 = shalt.err (!%p154_p7)
}
   0xf   :  { %19 = dma.hbm_to_vmem [thread:$0]  %s216_s0, 32, %s17_s16, [#allocation7]  }
  0x10   :  { %158 = dma.done.wait [#allocation7], 32  }
  0x11   :  { %159 = vsyncadd [#allocation7], 4294967264  ;;  %v161_v0 = vmov 0.0   ;;  %v56_v1 = vld [vmem:[%s219_s3] sm:$0x3]  ;;  %vm91_vm6 = vcmask 1040384  }
  0x12   :  { %35 = vst [vmem:[#allocation4] sm:$0x1] %v161_v0  ;;  %33 = vst [vmem:[#allocation2] sm:$0x1] %v161_v0  ;;  %v57_v2 = vld [vmem:[%s218_s2] sm:$0x3] }
  0x13   :  { %34 = vst [vmem:[#allocation3] sm:$0x1] %v161_v0  ;;  %36 = vst [vmem:[#allocation5] sm:$0x1] %v161_v0  ;;  %v37_v3 = vld [vmem:[%s217_s1] sm:$0x3]  ;;  %v58_v4 = vsub.f32 %v56_v1, %v57_v2 }
  0x14   :  { %vm71_vm0 = vcmp.ne.f32.partialorder %v56_v1, 0.0  ;;  %v38_v5 = vld [vmem:[#allocation6] sm:$0x3]  ;;  %vm52_vm1 = vcmp.ne.f32.partialorder %v37_v3, 0.0  ;;  %vm117_vm7 = vcmask 1041408   ;;  %vm119_vm8 = vcmask 1042432  }
  0x15   :  { %v39_v6 = vsub.f32 %v37_v3, %v38_v5  ;;  %v128_v7 = vsel %vm52_vm1, 1.0, %v161_v0  ;;  %v59_v9 = vmul.f32 %v58_v4, %v58_v4  ;;  %v129_v10 = vsel %vm71_vm0, 1.0, %v161_v0 }
  0x16   :  { %vm121_vm9 = vcmask 3072  }
  0x17   :  { %v40_v13 = vmul.f32 %v39_v6, %v39_v6  ;;  %v61_v15 = vrot.slane %v59_v9, 1 }
  0x19   :  { %v42_v16 = vrot.slane %v40_v13, 1  ;;  %v63_v17 = vadd.f32 %v61_v15, %v59_v9  ;;  %v81_v27 = vld [vmem:[#allocation4] sm:$0x1]  ;;  %v75_v31 = vld [vmem:[#allocation2] sm:$0x1] }
  0x1a   :  { %v78_v8 = vld [vmem:[#allocation3] sm:$0x1]  ;;  %v84_v12 = vld [vmem:[#allocation5] sm:$0x1] }
  0x1b   :  { %v79_v11 = vadd.f32 %v128_v7, %v78_v8  ;;  %v85_v14 = vadd.f32 %v129_v10, %v84_v12  ;;  %v44_v18 = vadd.f32 %v42_v16, %v40_v13  ;;  %132 = vrsqrt.f32 %v63_v17 }
  0x1c   :  { %vm66_vm2 = vcmp.eq.f32.partialorder %v63_v17, inf  ;;  %v69_v20 = vand.u32 2147483648, %v63_v17  ;;  %vm68_vm3 = vcmp.eq.f32.partialorder %v63_v17, 0.0 }
  0x1d   :  { %80 = vst [vmem:[#allocation3] sm:$0x1] %v79_v11  ;;  %86 = vst [vmem:[#allocation5] sm:$0x1] %v85_v14  ;;  %134 = vrsqrt.f32 %v44_v18  ;;  %vm47_vm4 = vcmp.eq.f32.partialorder %v44_v18, inf  ;;  %v50_v23 = vand.u32 2147483648, %v44_v18 }
  0x1e   :  { %vm49_vm5 = vcmp.eq.f32.partialorder %v44_v18, 0.0 }
  0x24   :  { %v99_v36 = vld [vmem:[#allocation3] sm:$0x1]  ;;  %v103_v39 = vld [vmem:[#allocation5] sm:$0x1] }
  0x25   :  { %v133_v19 = vpop.eup %132  ;;  %v100_v41 = vsel %vm91_vm6, %v99_v36, 0.0  ;;  %v104_v42 = vsel %vm91_vm6, %v103_v39, 0.0 }
  0x26   :  { %v65_v22 = vmul.f32 %v133_v19, %v63_v17 }
  0x27   :  { %v135_v21 = vpop.eup %134 }
  0x28   :  { %v46_v24 = vmul.f32 %v135_v21, %v44_v18  ;;  %v67_v25 = vsel %vm66_vm2, %v63_v17, %v65_v22 }
  0x29   :  { %v70_v26 = vsel %vm68_vm3, %v69_v20, %v67_v25 }
  0x2a   :  { %v48_v28 = vsel %vm47_vm4, %v44_v18, %v46_v24  ;;  %v74_v29 = vmul.f32 %v129_v10, %v70_v26 }
  0x2b   :  { %v51_v30 = vsel %vm49_vm5, %v50_v23, %v48_v28 }
  0x2c   :  { %v55_v32 = vmul.f32 %v128_v7, %v51_v30  ;;  %v82_v33 = vadd.f32 %v81_v27, %v74_v29 }
  0x2e   :  { %v76_v34 = vadd.f32 %v75_v31, %v55_v32  ;;  %83 = vst [vmem:[#allocation4] sm:$0x1] %v82_v33 }
  0x30   :  { %77 = vst [vmem:[#allocation2] sm:$0x1] %v76_v34 }
  0x35   :  { %v95_v35 = vld [vmem:[#allocation4] sm:$0x1] }
  0x36   :  { %v96_v37 = vsel %vm91_vm6, %v95_v35, 0.0 }
  0x37   :  { %v90_v38 = vld [vmem:[#allocation2] sm:$0x1]  ;;  %97 = vadd.xlane.f32.xlu0 %v96_v37 }
  0x38   :  { %v92_v40 = vsel %vm91_vm6, %v90_v38, 0.0 }
  0x39   :  { %93 = vadd.xlane.f32.xlu1 %v92_v40 }
  0x3b   :  { %101 = vadd.xlane.f32.xlu0 %v100_v41 }
  0x3d   :  { %105 = vadd.xlane.f32.xlu1 %v104_v42 }
  0xc4   :  { %v98_v43 = vpop.xlane.xlu0 %97 }
  0xc5   :  { %v108_v45 = vrot.slane %v98_v43, 7 }
  0xc6   :  { %v94_v44 = vpop.xlane.xlu1 %93 }
  0xc7   :  { %v116_v49 = vsel %vm91_vm6, %v94_v44, %v108_v45 }
  0xc8   :  { %v102_v46 = vpop.xlane.xlu0 %101 }
  0xc9   :  { %v111_v47 = vrot.slane %v102_v46, 6 }
  0xca   :  { %v106_v48 = vpop.xlane.xlu1 %105 }
  0xcb   :  { %v114_v50 = vrot.slane %v106_v48, 5  ;;  %v118_v51 = vsel %vm117_vm7, %v116_v49, %v111_v47 }
  0xcd   :  { %v120_v52 = vsel %vm119_vm8, %v118_v51, %v114_v50 }
  0xce   :  { %122 = vst.msk [vmem:[%s220_s4] sm:$0xf] %vm121_vm9, %v120_v52 }
  0xcf   :  { %127 = vsyncpa [#allocation7], 1 }

</bundles_post_ra>
